<compile_context>
chip_gen: v7x
topology: tpu7x:2x2x1
jax: 0.10.0
libtpu: 0.0.40
codegen_flags: <defaults>
</compile_context>

<pallas_src>
import functools
import math

import jax
import jax.numpy as jnp
from jax.experimental import pallas as pl
from jax.experimental.pallas import tpu as pltpu

N_MASK = 64  # fixed by Model.__init__: attn_mask = torch.zeros(64, 64).bool()


def _choose_heads_per_step(h, d, n):
    """Smallest head-block size (dividing h) that keeps both the input block
    (n, hb*d) and the output block (n, hb*n) lane-dense (last dim % 128 == 0).
    Falls back to the whole head axis (block == full array is always legal)."""
    for hb in range(1, h + 1):
        if h % hb:
            continue
        if (hb * d) % 128 == 0 and (hb * n) % 128 == 0:
            return hb
    return h


def _scores_for_block(q_ref, k_ref, hb, d):
    """Per-head Q @ K^T / sqrt(D) for a lane-packed (N, hb*d) block.
    Returns hb (N, N) f32 score tiles."""
    scale = jnp.float32(1.0 / math.sqrt(d))
    q = q_ref[...] * scale          # scale the smaller operand once
    k = k_ref[...]
    outs = []
    for hh in range(hb):            # static unrolled loop over heads in block
        qh = q[:, hh * d:(hh + 1) * d]
        kh = k[:, hh * d:(hh + 1) * d]
        # Contract dim 1 with dim 1 (== q @ k.T): no transpose feeds the MXU.
        outs.append(jax.lax.dot_general(
            qh, kh, dimension_numbers=(((1,), (1,)), ((), ())),
            preferred_element_type=jnp.float32))
    return outs


def _attn_nomask_kernel(q_ref, k_ref, o_ref, *, hb, d):
    outs = _scores_for_block(q_ref, k_ref, hb, d)
    o_ref[...] = outs[0] if hb == 1 else jnp.concatenate(outs, axis=-1)


def _attn_masked_kernel(q_ref, k_ref, mask_ref, o_ref, *, hb, d):
    # masked_fill(mask, -inf) then masked_fill(mask, 0.0) == where(mask, 0, W)
    keep = mask_ref[...] == 0       # int32 mask compared directly (no convert)
    outs = [jnp.where(keep, s, jnp.float32(0.0))
            for s in _scores_for_block(q_ref, k_ref, hb, d)]
    o_ref[...] = outs[0] if hb == 1 else jnp.concatenate(outs, axis=-1)


def make_attention_mask_forward(attn_mask):
    """Build Model.forward specialized on the constant attn_mask buffer."""
    attn_mask = jnp.asarray(attn_mask)
    n = int(attn_mask.shape[0])
    # Constant-mask specialization: the Model buffer is all-False, so skip the
    # mask DMA + select entirely; keep the masked path for a dynamic mask.
    mask_has_true = bool(jax.device_get(attn_mask).any())
    # Hoisted once (not per call): bool -> int32 for a direct != 0 compare.
    mask_i32 = attn_mask.astype(jnp.int32) if mask_has_true else None

    def forward(query, key, value=None):
        del value  # forward ignores `value` (it only feeds the custom backward)
        q, k = jnp.asarray(query), jnp.asarray(key)
        single = q.ndim == 2
        if single:
            q, k = q[None], k[None]
        h, nq, d = q.shape
        assert nq == n, "query/key rows must match the mask size"

        # Lane-dense packing (layout plumbing): (H, N, D) -> (N, H*D).
        q_p = jnp.transpose(q, (1, 0, 2)).reshape(n, h * d)
        k_p = jnp.transpose(k, (1, 0, 2)).reshape(n, h * d)

        hb = _choose_heads_per_step(h, d, n)
        grid = (h // hb,)

        qk_spec = pl.BlockSpec((n, hb * d), lambda i: (0, i))
        out_spec = pl.BlockSpec((n, hb * n), lambda i: (0, i))
        compiler_params = pltpu.CompilerParams(
            dimension_semantics=("parallel",))  # megacore sharding on v7x

        if mask_has_true:
            kernel = functools.partial(_attn_masked_kernel, hb=hb, d=d)
            in_specs = [qk_spec, qk_spec,
                        pl.BlockSpec((n, n), lambda i: (0, 0))]
            args = (q_p, k_p, mask_i32)
        else:
            kernel = functools.partial(_attn_nomask_kernel, hb=hb, d=d)
            in_specs = [qk_spec, qk_spec]
            args = (q_p, k_p)

        out_p = pl.pallas_call(
            kernel,
            out_shape=jax.ShapeDtypeStruct((n, h * n), jnp.float32),
            grid=grid,
            in_specs=in_specs,
            out_specs=out_spec,
            compiler_params=compiler_params,
        )(*args)

        # Unpack lane-dense (N, H*N) back to per-head (H, N, N).
        out = jnp.transpose(out_p.reshape(n, h, n), (1, 0, 2))
        return out[0] if single else out

    return forward


# TODO(synk): Attention_mask.backward (custom autograd VJP) is not implemented;
# only the forward pass of Model is translated.

if __name__ == "__main__":
    rng = jax.random.PRNGKey(0)
    kq, kk, kv = jax.random.split(rng, 3)

    # The module-level 4-D demo tensors (64,3,16,16) are inconsistent with the
    # module's own matmul/(64,64) mask; use per-head (N=64, D=32) inputs and
    # batch H=8 heads into one pallas_call (the perf-oriented path).
    H, N, D = 8, N_MASK, 32
    query = jax.random.normal(kq, (H, N, D), dtype=jnp.float32)
    key_t = jax.random.normal(kk, (H, N, D), dtype=jnp.float32)
    value = jax.random.normal(kv, (H, N, D), dtype=jnp.float32)
    # Model.__init__: torch.zeros(64, 64).bool() -> all-False constant buffer.
    attn_mask = jnp.zeros((N, N), dtype=jnp.bool_)

    forward = make_attention_mask_forward(attn_mask)

    # Batched 8-head call.
    out = jax.block_until_ready(forward(query, key_t, value))

    # Pure-JAX reference of the PyTorch forward semantics (per head).
    ref = jnp.einsum("hnd,hmd->hnm", query, key_t) / math.sqrt(D)
    ref = jnp.where(attn_mask[None], -jnp.inf, ref)   # masked_fill(mask, -inf)
    ref = jnp.where(attn_mask[None], 0.0, ref)        # masked_fill(mask, 0.0)
    assert out.shape == (H, N, N) and out.dtype == jnp.float32
    assert jnp.allclose(out, ref, atol=1e-5, rtol=1e-5)

    # Exact single-head Model.forward call (H == 1) through the same kernel.
    out1 = jax.block_until_ready(forward(query[0], key_t[0], value[0]))
    assert out1.shape == (N, N)
    assert jnp.allclose(out1, ref[0], atol=1e-5, rtol=1e-5)

    # Dynamic (non-trivial) mask exercises the masked-kernel fallback path.
    row = jax.lax.broadcasted_iota(jnp.int32, (N, N), 0)
    col = jax.lax.broadcasted_iota(jnp.int32, (N, N), 1)
    dyn_mask = col > row
    out_m = jax.block_until_ready(
        make_attention_mask_forward(dyn_mask)(query, key_t, value))
    ref_m = jnp.where(dyn_mask[None], 0.0,
                      jnp.einsum("hnd,hmd->hnm", query, key_t) / math.sqrt(D))
    assert jnp.allclose(out_m, ref_m, atol=1e-5, rtol=1e-5)

    print("KERNEL_OK")
</pallas_src>

<mosaic_0001>
module attributes {stable_mosaic.version = 11 : i64} {
  func.func @_attn_nomask_kernel(%arg0: i32, %arg1: memref<64x128xf32, #tpu.memory_space<vmem>>, %arg2: memref<64x128xf32, #tpu.memory_space<vmem>>, %arg3: memref<64x256xf32, #tpu.memory_space<vmem>>) attributes {dimension_semantics = [#tpu.dimension_semantics<parallel>], iteration_bounds = array<i64: 2>, scalar_prefetch = 0 : i64, scratch_operands = 0 : i64, tpu.core_type = #tpu.core_type<tc>, window_params = [{transform_indices = @transform_0, window_bounds = array<i64: 64, 128>}, {transform_indices = @transform_1, window_bounds = array<i64: 64, 128>}, {transform_indices = @transform_2, window_bounds = array<i64: 64, 256>}]} {
    %c0 = arith.constant 0 : index
    %c0_0 = arith.constant 0 : index
    %0 = vector.load %arg1[%c0, %c0_0] : memref<64x128xf32, #tpu.memory_space<vmem>>, vector<64x128xf32>
    %cst = arith.constant 0.176776692 : f32
    %1 = vector.broadcast %cst : f32 to vector<64x128xf32>
    %2 = arith.mulf %0, %1 : vector<64x128xf32>
    %c0_1 = arith.constant 0 : index
    %c0_2 = arith.constant 0 : index
    %3 = vector.load %arg2[%c0_1, %c0_2] : memref<64x128xf32, #tpu.memory_space<vmem>>, vector<64x128xf32>
    %4 = vector.extract_strided_slice %2 {offsets = [0, 0], sizes = [64, 32], strides = [1, 1]} : vector<64x128xf32> to vector<64x32xf32>
    %5 = vector.extract_strided_slice %3 {offsets = [0, 0], sizes = [64, 32], strides = [1, 1]} : vector<64x128xf32> to vector<64x32xf32>
    %cst_3 = arith.constant dense<0.000000e+00> : vector<64x64xf32>
    %6 = tpu.matmul %4, %5, %cst_3 {dimension_numbers = #tpu.dot_dimension_numbers<[1], [1], [0], [0], [0, 0, 1, 0], [], []>} : vector<64x32xf32>, vector<64x32xf32>, vector<64x64xf32> -> vector<64x64xf32>
    %7 = vector.extract_strided_slice %2 {offsets = [0, 32], sizes = [64, 32], strides = [1, 1]} : vector<64x128xf32> to vector<64x32xf32>
    %8 = vector.extract_strided_slice %3 {offsets = [0, 32], sizes = [64, 32], strides = [1, 1]} : vector<64x128xf32> to vector<64x32xf32>
    %cst_4 = arith.constant dense<0.000000e+00> : vector<64x64xf32>
    %9 = tpu.matmul %7, %8, %cst_4 {dimension_numbers = #tpu.dot_dimension_numbers<[1], [1], [0], [0], [0, 0, 1, 0], [], []>} : vector<64x32xf32>, vector<64x32xf32>, vector<64x64xf32> -> vector<64x64xf32>
    %10 = vector.extract_strided_slice %2 {offsets = [0, 64], sizes = [64, 32], strides = [1, 1]} : vector<64x128xf32> to vector<64x32xf32>
    %11 = vector.extract_strided_slice %3 {offsets = [0, 64], sizes = [64, 32], strides = [1, 1]} : vector<64x128xf32> to vector<64x32xf32>
    %cst_5 = arith.constant dense<0.000000e+00> : vector<64x64xf32>
    %12 = tpu.matmul %10, %11, %cst_5 {dimension_numbers = #tpu.dot_dimension_numbers<[1], [1], [0], [0], [0, 0, 1, 0], [], []>} : vector<64x32xf32>, vector<64x32xf32>, vector<64x64xf32> -> vector<64x64xf32>
    %13 = vector.extract_strided_slice %2 {offsets = [0, 96], sizes = [64, 32], strides = [1, 1]} : vector<64x128xf32> to vector<64x32xf32>
    %14 = vector.extract_strided_slice %3 {offsets = [0, 96], sizes = [64, 32], strides = [1, 1]} : vector<64x128xf32> to vector<64x32xf32>
    %cst_6 = arith.constant dense<0.000000e+00> : vector<64x64xf32>
    %15 = tpu.matmul %13, %14, %cst_6 {dimension_numbers = #tpu.dot_dimension_numbers<[1], [1], [0], [0], [0, 0, 1, 0], [], []>} : vector<64x32xf32>, vector<64x32xf32>, vector<64x64xf32> -> vector<64x64xf32>
    %16 = tpu.concatenate %6, %9, %12, %15 in 1 : vector<64x64xf32>, vector<64x64xf32>, vector<64x64xf32>, vector<64x64xf32> -> vector<64x256xf32>
    %c0_7 = arith.constant 0 : index
    %c0_8 = arith.constant 0 : index
    %17 = vector.load %arg3[%c0_7, %c0_8] : memref<64x256xf32, #tpu.memory_space<vmem>>, vector<64x256xf32>
    tpu.vector_store %arg3[%c0_7, %c0_8], %16 {strides = array<i32>} : memref<64x256xf32, #tpu.memory_space<vmem>>, vector<64x256xf32>,
    return
  }
  func.func @transform_0(%arg0: i32) -> (i32, i32) {
    %c0_i32 = arith.constant 0 : i32
    %c0_i32_0 = arith.constant 0 : i32
    return %c0_i32, %arg0 : i32, i32
  }
  func.func @transform_1(%arg0: i32) -> (i32, i32) {
    %c0_i32 = arith.constant 0 : i32
    %c0_i32_0 = arith.constant 0 : i32
    return %c0_i32, %arg0 : i32, i32
  }
  func.func @transform_2(%arg0: i32) -> (i32, i32) {
    %c0_i32 = arith.constant 0 : i32
    %c0_i32_0 = arith.constant 0 : i32
    return %c0_i32, %arg0 : i32, i32
  }
}

</mosaic_0001>

<bundles_post_ra>
// kernel: tpu_custom_call.1
= control target key start
LH: loop header
LB: loop body
LE: loop exit
PB: predicated region body
PF: predicated region fallthrough
CT: control target
= control target key end

     0   :  { %7 = vsyncpa [#allocation3], 0  ;;  %s2191_s0 = inlined_call_operand.hbm [shape: f32[64,256], index: 0, kind: input, shape index: {}]   ;;  %s2192_s1 = inlined_call_operand.hbm [shape: f32[64,256], index: 1, kind: input, shape index: {}]   ;;  %s2193_s2 = inlined_call_operand.hbm [shape: f32[64,512], index: 2, kind: output, shape index: {}]  }
   0x1   :  { %9 = vsyncpa [#allocation3 + $0x1], 0 }
   0x2   :  { %10 = vsyncpa [#allocation6], 0 }
   0x3   :  { %12 = vsyncpa [#allocation6 + $0x1], 0 }
   0x4   :  { %13 = vsyncpa [#allocation4], 0 }
   0x5   :  { %15 = vsyncpa [#allocation4 + $0x1], 0  ;;  %s1725_s9 = smov 0   ;;  %s1727_s10 = smov 0  }
   0x6   :  { %s1729_s11 = smov 0   ;;  %s1731_s12 = smov 0  }
   0x7 LB: > { %s1746_s13 = sadd.s32 4294967295, %s1696_s12   ;;  %s1093_s14 = sadd.s32 4294967294, %s1696_s12   ;;  %s1696_s12 = sphi %s1731_s12, %s2212_s12   ;;  %s1692_s11 = sphi %s1729_s11, %s2211_s11   ;;  %s1688_s10 = sphi %s1727_s10, %s2210_s10   ;;  %s1684_s9 = sphi %s1725_s9, %s2209_s9  }
   0x8   : > { %s1750_s15 = sadd.s32 1, %s1696_s12   ;;  %s28_s16 = sadd.s32 1, %s1692_s11 }
   0x9   : > { %s25_s17 = ssub.s32 %s1696_s12, %s1750_s15  ;;  %p35_p0 = scmp.ne.s32.totalorder %s1692_s11, %s1688_s10 }
   0xa   : > { %p26_p1 = scmp.eq.s32.totalorder %s25_s17, 0  ;;  %p36_p2 = scmp.eq.s32.totalorder %s1696_s12, 0 }
   0xb   : > { %p41_p3 = scmp.ne.s32.totalorder %s1688_s10, %s1684_s9  ;;  %p42_p4 = scmp.eq.s32.totalorder %s1746_s13, 0 }
   0xc   : > { %s1762_s18 = scalar_select %p26_p1, %s1692_s11, %s28_s16  }
   0xd   : > { %p1764_p5 = por %p36_p2, %p35_p0  ;;  %p1768_p6 = por %p42_p4, %p41_p3 }
   0xe   : > { %p91_p7 = scmp.eq.s32.totalorder %s1746_s13, 1  ;;  %p97_p8 = scmp.eq.s32.totalorder %s1093_s14, 1 }
   0xf   : > { %s2197_s20 = scalar_select %p1768_p6, 1, 0 }
  0x10   : > { %p1463_p10 = scmp.lt.s32.totalorder %s1696_s12, 2  ;;  %p1775_p11 = por %p91_p7, %p35_p0 }
  0x11   : > { %p1779_p12 = por %p97_p8, %p41_p3  ;;  %s1784_s23 = sand.u32 1, %s1692_s11  }
  0x12   : > { %s2198_s21 = scalar_select %p1775_p11, 1, 0 }
  0x13   : > { %s2199_s22 = scalar_select %p1779_p12, 1, 0 }
  0x14   : > { %s1097_s24 = sshll.u32 %s1696_s12, 7  ;;  %s1096_s25 = sshll.u32 %s1784_s23, 6 }
  0x15   : > { %s1793_s28 = scalar_lea.hbm %s2191_s0, %s1097_s24  ;;  %s121_s29 = scalar_lea.vmem [#allocation2], %s1096_s25 }
  0x16   : > { %s127_s30 = sshll.u32 %s121_s29, 4  ;;  %p1799_p13 = pnand %p1463_p10, %p1764_p5  ;;  %s1803_s30 = int_to_ptr.vmem [resolvable:$true] %s127_s30 }
  0x17   : > { %s118_s4 = scalar_lea.sflag [#allocation3], %s1784_s23  ;;  %s1566_s5 = scalar_lea.hbm %s1793_s28, 1024 }
  0x18   : > { %p1567_p1 = scmp.ne.s32.totalorder %s1793_s28, %s1566_s5  ;;  %p1568_p2 = pneg %p1799_p13 }
  0x19   : > { %s1571_s8 = scalar_lea.hbm %s2191_s0, 2048  ;;  %p1572_p5 = scmp.lt.u32.totalorder %s1793_s28, %s2191_s0 }
  0x1a   : > { %p1569_p3 = pnand %p1568_p2, %p1567_p1  ;;  %p1573_p7 = scmp.lt.u32.totalorder %s1571_s8, %s1566_s5 }
  0x1b   : > { %p1575_p10 = scmp.lt.u32.totalorder %s1566_s5, %s1793_s28 }
  0x1c   : > { %p1570_p4 = pneg %p1569_p3  ;;  %p1574_p8 = por %p1573_p7, %p1572_p5 }
  0x1e   : > { %p1576_p9 = por %p1575_p10, %p1574_p8 }
  0x20   : > { %p1577_p0 = pnand %p1576_p9, %p1570_p4 }
  0x22   : > { %1580 = shalt.err (!%p1577_p0)
}
  0x23   : > { %s1581_s17 = scalar_lea.vmem %s1803_s30, 1024  ;;  %s1698_s19 = smov [#allocation2]  }
  0x24   : > { %p1582_p1 = scmp.ne.s32.totalorder %s1803_s30, %s1581_s17  ;;  %s1586_s26 = sshll.u32 %s1698_s19, 4  ;;  %s1587_s26 = int_to_ptr.vmem [resolvable:$false] %s1586_s26 }
  0x25   : > { %s1588_s27 = scalar_lea.vmem %s1587_s26, 2048  ;;  %p1589_p11 = scmp.lt.s32.totalorder %s1803_s30, %s1587_s26 }
  0x26   : > { %p1584_p3 = pnand %p1582_p1, %p1568_p2  ;;  %p1590_p5 = scmp.lt.s32.totalorder %s1588_s27, %s1581_s17 }
  0x28   : > { %p1585_p12 = pneg %p1584_p3  ;;  %p1591_p7 = por %p1590_p5, %p1589_p11 }
  0x2a   : > { %p1592_p8 = pnand %p1591_p7, %p1585_p12 }
  0x2c   : > { %1595 = shalt.err (!%p1592_p8)
}
  0x2d   : > { %s1699_s29 = smov 256   ;;  %s1700_s5 = smov 128  }
  0x2e   : > { %s1701_s6 = smov 8   ;;  %p155_p9 = scmp.lt.s32.totalorder %s1696_s12, 3 }
  0x2f   : > { %1455 = dma.hbm_to_vmem [thread:$0]  (!%p1799_p13), %s1793_s28, 1024, %s1803_s30, %s118_s4, %s1699_s29, %s1700_s5, %s1701_s6  }
  0x30   : > { %s1843_s14 = scalar_lea.hbm %s2192_s1, %s1097_s24  ;;  %p2201_p11 = scmp.ge.s32.totalorder %s1696_s12, 1 }
  0x31   : > { %s141_s17 = scalar_lea.vmem [#allocation5], %s1096_s25  ;;  %s138_s28 = scalar_lea.sflag [#allocation6], %s1784_s23 }
  0x32   : > { %p1847_p12 = pnand %p2201_p11, %p155_p9  ;;  %s147_s19 = sshll.u32 %s141_s17, 4  ;;  %s1853_s19 = int_to_ptr.vmem [resolvable:$true] %s147_s19 }
  0x33   : > { %s1596_s30 = scalar_lea.hbm %s1843_s14, 1024  ;;  %s1601_s26 = scalar_lea.hbm %s2192_s1, 2048 }
  0x34   : > { %p1597_p0 = scmp.ne.s32.totalorder %s1843_s14, %s1596_s30  ;;  %p1602_p1 = scmp.lt.u32.totalorder %s1843_s14, %s2192_s1 }
  0x35   : > { %p1603_p3 = scmp.lt.u32.totalorder %s1601_s26, %s1596_s30  ;;  %p1605_p7 = scmp.lt.u32.totalorder %s1596_s30, %s1843_s14 }
  0x36   : > { %p1599_p4 = pnand %p1597_p0, %p1568_p2 }
  0x37   : > { %p1604_p5 = por %p1603_p3, %p1602_p1 }
  0x38   : > { %p1600_p10 = pneg %p1599_p4 }
  0x39   : > { %p1606_p8 = por %p1605_p7, %p1604_p5 }
  0x3b   : > { %p1607_p9 = pnand %p1606_p8, %p1600_p10 }
  0x3d   : > { %1610 = shalt.err (!%p1607_p9)
}
  0x3e   : > { %s1611_s25 = scalar_lea.vmem %s1853_s19, 1024  ;;  %s1702_s8 = smov [#allocation5]  }
  0x3f   : > { %p1612_p11 = scmp.ne.s32.totalorder %s1853_s19, %s1611_s25  ;;  %s1616_s17 = sshll.u32 %s1702_s8, 4  ;;  %s1617_s17 = int_to_ptr.vmem [resolvable:$false] %s1616_s17 }
  0x40   : > { %s1618_s24 = scalar_lea.vmem %s1617_s17, 2048  ;;  %p1619_p6 = scmp.lt.s32.totalorder %s1853_s19, %s1617_s17 }
  0x41   : > { %p1614_p0 = pnand %p1612_p11, %p1568_p2  ;;  %p1620_p1 = scmp.lt.s32.totalorder %s1618_s24, %s1611_s25 }
  0x43   : > { %p1615_p4 = pneg %p1614_p0  ;;  %p1621_p3 = por %p1620_p1, %p1619_p6 }
  0x45   : > { %p1622_p5 = pnand %p1621_p3, %p1615_p4 }
  0x47   : > { %1625 = shalt.err (!%p1622_p5)
}
  0x48   : > { %1458 = dma.hbm_to_vmem [thread:$0]  (!%p1799_p13), %s1843_s14, 1024, %s1853_s19, %s138_s28, %s1699_s29, %s1700_s5, %s1701_s6  }
  0x49   : > { %159 = sbr.rel (%p1847_p12) target bundleno = 626 (0x272), region = 28  ;;  %s1887_s30 = sand.u32 (!%p1847_p12), 1, %s1688_s10  }
  0x4a   : > { %s1101_s4 = sshll.u32 (!%p1847_p12), %s1887_s30, 6  ;;  %s162_s26 = scalar_lea.sflag (!%p1847_p12), [#allocation3], %s1887_s30 }
  0x4b   : > { %s1891_s3 = scalar_lea.vmem (!%p1847_p12), [#allocation2], %s1101_s4  ;;  %p2203_p6 = scmp.ne.s32.totalorder (!%p1847_p12), %s2197_s20, 0 }
  0x50   : > { %1671 = dma.done.wait (%p2203_p6), %s162_s26, 1024  }
  0x51   : > { %1673 = vsyncadd (%p2203_p6), %s162_s26, 4294966272  ;;  %s171_s23 = scalar_lea.sflag [#allocation6], %s1887_s30  ;;  %s174_s29 = scalar_lea.vmem [#allocation5], %s1101_s4 }
  0x52   : > { %1675 = dma.done.wait (%p2203_p6), %s171_s23, 1024  }
  0x53   : > { %1677 = vsyncadd (%p2203_p6), %s171_s23, 4294966272  ;;  %v1902_v0 = vld [vmem:[%s174_s29] sm:$0xff]  ;;  %v1904_v1 = vld [vmem:[%s174_s29 + $0x8] sm:$0xff]  ;;  %s1703_s20 = smov 96   ;;  %vm225_vm0 = vcmask 261120   ;;  %s1704_s5 = smov 32  }
  0x54   : > { %v1906_v2 = vld [vmem:[%s174_s29 + $0x10] sm:$0xff]  ;;  %v1506_v3 = vpack.i.bf16 %v1904_v1, %v1902_v0  ;;  %v1910_v4 = vld [vmem:[%s174_s29 + $0x18] sm:$0xff]  ;;  %v1912_v5 = vld [vmem:[%s174_s29 + $0x20] sm:$0xff]  ;;  %s1705_s6 = smov 64   ;;  %v1350_v28 = vpack.c.bf16 %v1904_v1, %v1902_v0  ;;  %s1103_s14 = sshll.u32 %s1887_s30, 7  ;;  %vm950_vm2 = vcmask 523264  }
  0x55   : > { %v1914_v6 = vld [vmem:[%s174_s29 + $0x28] sm:$0xff]  ;;  %v1918_v8 = vld [vmem:[%s174_s29 + $0x30] sm:$0xff]  ;;  %v1920_v9 = vld [vmem:[%s174_s29 + $0x38] sm:$0xff]  ;;  %v1511_v11 = vpack.i.bf16 %v1910_v4, %v1906_v2  ;;  %v1356_v29 = vpack.c.bf16 %v1910_v4, %v1906_v2  ;;  %s2104_s16 = scalar_lea.vmem [#allocation7], %s1103_s14  ;;  %s1173_s19 = sshll.u32 %s1746_s13, 8 }
  0x56   : > { %v1516_v7 = vpack.i.bf16 %v1914_v6, %v1912_v5  ;;  %v201_v10 = vld [vmem:[%s1891_s3] sm:$0xff]  ;;  %1507 = vrot.lane.b32.xlu0 %v1506_v3, %s1703_s20  ;;  %v1521_v13 = vpack.i.bf16 %v1920_v9, %v1918_v8  ;;  %v202_v14 = vld [vmem:[%s1891_s3 + $0x8] sm:$0xff]  ;;  %v203_v16 = vld [vmem:[%s1891_s3 + $0x10] sm:$0xff]  ;;  %v1362_v31 = vpack.c.bf16 %v1914_v6, %v1912_v5  ;;  %v1368_v32 = vpack.c.bf16 %v1920_v9, %v1918_v8  ;;  %s997_s28 = sshll.u32 %s2104_s16, 4  ;;  %s2141_s25 = scalar_lea.hbm %s2193_s2, %s1173_s19  ;;  %s2143_s28 = int_to_ptr.vmem [resolvable:$true] %s997_s28 }
  0x57   : > { %v209_v12 = vmul.f32 0.17677669, %v201_v10  ;;  %v210_v15 = vmul.f32 0.17677669, %v202_v14  ;;  %v211_v17 = vmul.f32 0.17677669, %v203_v16  ;;  %vm1975_vm1 = vmpackc.low %vm225_vm0, %vm225_vm0 }
  0x58   : > { %1517 = vrot.lane.b32.xlu1 %v1516_v7, %s1703_s20  ;;  %v204_v18 = vld [vmem:[%s1891_s3 + $0x18] sm:$0xff]  ;;  %v205_v20 = vld [vmem:[%s1891_s3 + $0x20] sm:$0xff]  ;;  %v206_v21 = vld [vmem:[%s1891_s3 + $0x28] sm:$0xff]  ;;  %1352 = vmatprep.subr.msk.bf16.mxu0 %vm1975_vm1, %v1350_v28  ;;  %s984_s13 = scalar_lea.sflag [#allocation4], %s1887_s30  ;;  %s1626_s8 = scalar_lea.vmem %s2143_s28, 2048 }
  0x59   : > { %1254 = vmatprep.mubr.msk.f32.mxu0 %vm225_vm0, %v209_v12  ;;  %v212_v19 = vmul.f32 0.17677669, %v204_v18  ;;  %v213_v22 = vmul.f32 0.17677669, %v205_v20  ;;  %v214_v23 = vmul.f32 0.17677669, %v206_v21  ;;  %1355 = vmatpush3.bf16.xpose.msk.msra.mxu0 %vm1975_vm1, %v1350_v28  ;;  %p1627_p13 = scmp.ne.s32.totalorder %s2143_s28, %s1626_s8 }
  0x5a   : > { %1512 = vrot.lane.b32.xlu0 %v1511_v11, %s1703_s20  ;;  %v207_v24 = vld [vmem:[%s1891_s3 + $0x30] sm:$0xff]  ;;  %v208_v25 = vld [vmem:[%s1891_s3 + $0x38] sm:$0xff]  ;;  %1358 = vmatprep.subr.msk.bf16.mxu0 %vm1975_vm1, %v1356_v29  ;;  %p2206_p2 = scmp.ne.s32.totalorder %s2198_s21, 0  ;;  %s1706_s17 = smov [#allocation7]  }
  0x5b   : > { %v215_v26 = vmul.f32 0.17677669, %v207_v24  ;;  %v216_v27 = vmul.f32 0.17677669, %v208_v25  ;;  %s1630_s24 = sshll.u32 %s1706_s17, 4  ;;  %s1631_s24 = int_to_ptr.vmem [resolvable:$false] %s1630_s24 }
  0x5c   : > { %1522 = vrot.lane.b32.xlu1 %v1521_v13, %s1703_s20  ;;  %p1628_p12 = pnand %p1627_p13, %p2206_p2  ;;  %s1632_s4 = scalar_lea.vmem %s1631_s24, 4096 }
  0x5d   : > { %p1633_p7 = scmp.lt.s32.totalorder %s2143_s28, %s1631_s24  ;;  %p1634_p8 = scmp.lt.s32.totalorder %s1632_s4, %s1626_s8 }
  0x5e   : > { %1527 = vrot.lane.b32.xlu0 %v1506_v3, %s1704_s5  ;;  %p1629_p10 = pneg %p1628_p12 }
  0x5f   : > { %p1635_p9 = por %p1634_p8, %p1633_p7 }
  0x60   : > { %379 = vrot.lane.b32.xlu1 %v209_v12, %s1703_s20 }
  0x61   : > { %1361 = vmatpush3.bf16.xpose.msk.msra.mxu0 %vm1975_vm1, %v1356_v29  ;;  %p1636_p11 = pnand %p1635_p9, %p1629_p10 }
  0x62   : > { %381 = vrot.lane.b32.xlu0 %v210_v15, %s1703_s20  ;;  %1364 = vmatprep.subr.msk.bf16.mxu0 %vm1975_vm1, %v1362_v31 }
  0x64   : > { %1532 = vrot.lane.b32.xlu1 %v1511_v11, %s1704_s5 }
  0x66   : > { %1537 = vrot.lane.b32.xlu0 %v1516_v7, %s1704_s5 }
  0x68   : > { %383 = vrot.lane.b32.xlu1 %v211_v17, %s1703_s20 }
  0x69   : > { %1367 = vmatpush3.bf16.xpose.msk.msra.mxu0 %vm1975_vm1, %v1362_v31 }
  0x6a   : > { %385 = vrot.lane.b32.xlu0 %v212_v19, %s1703_s20  ;;  %1370 = vmatprep.subr.msk.bf16.mxu0 %vm1975_vm1, %v1368_v32 }
  0x6c   : > { %1542 = vrot.lane.b32.xlu1 %v1521_v13, %s1704_s5 }
  0x6e   : > { %387 = vrot.lane.b32.xlu0 %v213_v22, %s1703_s20 }
  0x70   : > { %389 = vrot.lane.b32.xlu1 %v214_v23, %s1703_s20 }
  0x71   : > { %1373 = vmatpush3.bf16.xpose.msk.msra.mxu0 %vm1975_vm1, %v1368_v32 }
  0x72   : > { %391 = vrot.lane.b32.xlu0 %v215_v26, %s1703_s20 }
  0x74   : > { %393 = vrot.lane.b32.xlu1 %v216_v27, %s1703_s20 }
  0x76   : > { %717 = vrot.lane.b32.xlu0 %v209_v12, %s1704_s5 }
  0x78   : > { %719 = vrot.lane.b32.xlu1 %v210_v15, %s1704_s5  ;;  %1255 = vmatmul.mubr.msk.f32.vlgmr.msra.gmra.mrb[0].mxu0 %vm225_vm0, %v210_v15 }
  0x79   : > { %1257 = vmatprep.mubr.msk.f32.mxu0 %vm225_vm0, %v211_v17 }
  0x7a   : > { %721 = vrot.lane.b32.xlu0 %v211_v17, %s1704_s5 }
  0x7c   : > { %723 = vrot.lane.b32.xlu1 %v212_v19, %s1704_s5  ;;  %1258 = vmatmul.mubr.msk.f32.gmra.mrb[2].mxu0 %vm225_vm0, %v212_v19 }
  0x7d   : > { %1260 = vmatprep.mubr.msk.f32.mxu0 %vm225_vm0, %v213_v22 }
  0x7e   : > { %725 = vrot.lane.b32.xlu0 %v213_v22, %s1704_s5 }
  0x80   : > { %727 = vrot.lane.b32.xlu1 %v214_v23, %s1704_s5  ;;  %1261 = vmatmul.mubr.msk.f32.gmra.mrb[4].mxu0 %vm225_vm0, %v214_v23 }
  0x81   : > { %1263 = vmatprep.mubr.msk.f32.mxu0 %vm225_vm0, %v215_v26 }
  0x82   : > { %729 = vrot.lane.b32.xlu0 %v215_v26, %s1704_s5 }
  0x84   : > { %731 = vrot.lane.b32.xlu1 %v216_v27, %s1704_s5  ;;  %1264 = vmatmul.mubr.msk.f32.gmra.mrb[6].mxu0 %vm225_vm0, %v216_v27 }
  0x86   : > { %1547 = vrot.lane.b32.xlu0 %v1506_v3, %s1705_s6 }
  0x88   : > { %1552 = vrot.lane.b32.xlu1 %v1511_v11, %s1705_s6 }
  0x8a   : > { %1557 = vrot.lane.b32.xlu0 %v1516_v7, %s1705_s6 }
  0x8c   : > { %1562 = vrot.lane.b32.xlu1 %v1521_v13, %s1705_s6 }
  0x8e   : > { %548 = vrot.lane.b32.xlu0 %v209_v12, %s1705_s6 }
  0x90   : > { %550 = vrot.lane.b32.xlu1 %v210_v15, %s1705_s6 }
  0x92   : > { %552 = vrot.lane.b32.xlu0 %v211_v17, %s1705_s6 }
  0x94   : > { %554 = vrot.lane.b32.xlu1 %v212_v19, %s1705_s6 }
  0x96   : > { %556 = vrot.lane.b32.xlu0 %v213_v22, %s1705_s6 }
  0x98   : > { %558 = vrot.lane.b32.xlu1 %v214_v23, %s1705_s6 }
  0x9a   : > { %560 = vrot.lane.b32.xlu0 %v215_v26, %s1705_s6 }
  0x9c   : > { %562 = vrot.lane.b32.xlu1 %v216_v27, %s1705_s6 }
  0xc8   : > { %v1508_v33 = vpop.permute.xlu0 %1507 }
  0xc9   : > { %v1510_v34 = vunpack.i.h.bf16 %v1508_v33  ;;  %v1509_v35 = vunpack.i.l.bf16 %v1508_v33 }
  0xca   : > { %v1518_v36 = vpop.permute.xlu1 %1517 }
  0xcb   : > { %v1374_v37 = vpack.c.bf16 %v1510_v34, %v1509_v35  ;;  %v1520_v43 = vunpack.i.h.bf16 %v1518_v36  ;;  %v1519_v44 = vunpack.i.l.bf16 %v1518_v36 }
  0xcc   : > { %v1513_v38 = vpop.permute.xlu0 %1512 }
  0xcd   : > { %1376 = vmatprep.subr.msk.bf16.mxu1 %vm1975_vm1, %v1374_v37  ;;  %v1515_v39 = vunpack.i.h.bf16 %v1513_v38  ;;  %v1514_v40 = vunpack.i.l.bf16 %v1513_v38  ;;  %v1386_v47 = vpack.c.bf16 %v1520_v43, %v1519_v44 }
  0xce   : > { %v1523_v41 = vpop.permute.xlu1 %1522  ;;  %1379 = vmatpush3.bf16.xpose.msk.msra.mxu1 %vm1975_vm1, %v1374_v37 }
  0xcf   : > { %v1380_v42 = vpack.c.bf16 %v1515_v39, %v1514_v40  ;;  %v1525_v50 = vunpack.i.h.bf16 %v1523_v41  ;;  %v1524_v51 = vunpack.i.l.bf16 %v1523_v41 }
  0xd0   : > { %v1528_v45 = vpop.permute.xlu0 %1527 }
  0xd1   : > { %1382 = vmatprep.subr.msk.bf16.mxu1 %vm1975_vm1, %v1380_v42  ;;  %v1392_v54 = vpack.c.bf16 %v1525_v50, %v1524_v51  ;;  %v1530_v57 = vunpack.i.h.bf16 %v1528_v45  ;;  %v1529_v58 = vunpack.i.l.bf16 %v1528_v45 }
  0xd2   : > { %v380_v46 = vpop.permute.xlu1 %379 }
  0xd3   : > { %1282 = vmatprep.mubr.msk.f32.mxu1 %vm225_vm0, %v380_v46  ;;  %v1422_v61 = vpack.c.bf16 %v1530_v57, %v1529_v58 }
  0xd4   : > { %v382_v48 = vpop.permute.xlu0 %381 }
  0xd6   : > { %v1533_v49 = vpop.permute.xlu1 %1532  ;;  %1385 = vmatpush3.bf16.xpose.msk.msra.mxu1 %vm1975_vm1, %v1380_v42 }
  0xd7   : > { %1388 = vmatprep.subr.msk.bf16.mxu1 %vm1975_vm1, %v1386_v47  ;;  %v1535_v0 = vunpack.i.h.bf16 %v1533_v49  ;;  %v1534_v1 = vunpack.i.l.bf16 %v1533_v49 }
  0xd8   : > { %v1538_v52 = vpop.permute.xlu0 %1537 }
  0xd9   : > { %v1428_v4 = vpack.c.bf16 %v1535_v0, %v1534_v1  ;;  %v1540_v7 = vunpack.i.h.bf16 %v1538_v52  ;;  %v1539_v8 = vunpack.i.l.bf16 %v1538_v52 }
  0xda   : > { %v384_v53 = vpop.permute.xlu1 %383 }
  0xdb   : > { %v1434_v11 = vpack.c.bf16 %v1540_v7, %v1539_v8 }
  0xdc   : > { %v386_v55 = vpop.permute.xlu0 %385 }
  0xde   : > { %v1543_v56 = vpop.permute.xlu1 %1542  ;;  %1391 = vmatpush3.bf16.xpose.msk.msra.mxu1 %vm1975_vm1, %v1386_v47 }
  0xdf   : > { %1394 = vmatprep.subr.msk.bf16.mxu1 %vm1975_vm1, %v1392_v54  ;;  %v1545_v14 = vunpack.i.h.bf16 %v1543_v56  ;;  %v1544_v15 = vunpack.i.l.bf16 %v1543_v56 }
  0xe0   : > { %v388_v59 = vpop.permute.xlu0 %387 }
  0xe1   : > { %v1440_v22 = vpack.c.bf16 %v1545_v14, %v1544_v15 }
  0xe2   : > { %v390_v60 = vpop.permute.xlu1 %389 }
  0xe4   : > { %v392_v62 = vpop.permute.xlu0 %391 }
  0xe6   : > { %v394_v63 = vpop.permute.xlu1 %393  ;;  %1397 = vmatpush3.bf16.xpose.msk.msra.mxu1 %vm1975_vm1, %v1392_v54 }
  0xe7   : > { %1424 = vmatprep.subr.msk.bf16.mxu1 %vm1975_vm1, %v1422_v61 }
  0xe8   : > { %v718_v2 = vpop.permute.xlu0 %717 }
  0xea   : > { %v720_v3 = vpop.permute.xlu1 %719 }
  0xec   : > { %v722_v5 = vpop.permute.xlu0 %721 }
  0xed   : > { %1283 = vmatmul.mubr.msk.f32.vlgmr.msra.gmra.mrb[0].mxu1 %vm225_vm0, %v382_v48 }
  0xee   : > { %v724_v6 = vpop.permute.xlu1 %723  ;;  %1427 = vmatpush3.bf16.xpose.msk.msra.mxu1 %vm1975_vm1, %v1422_v61  ;;  %1285 = vmatprep.mubr.msk.f32.mxu1 %vm225_vm0, %v384_v53 }
  0xef   : > { %1430 = vmatprep.subr.msk.bf16.mxu1 %vm1975_vm1, %v1428_v4 }
  0xf0   : > { %v726_v9 = vpop.permute.xlu0 %725 }
  0xf1   : > { %1286 = vmatmul.mubr.msk.f32.gmra.mrb[2].mxu1 %vm225_vm0, %v386_v55 }
  0xf2   : > { %v728_v10 = vpop.permute.xlu1 %727  ;;  %1288 = vmatprep.mubr.msk.f32.mxu1 %vm225_vm0, %v388_v59 }
  0xf4   : > { %v730_v12 = vpop.permute.xlu0 %729 }
  0xf5   : > { %1289 = vmatmul.mubr.msk.f32.gmra.mrb[4].mxu1 %vm225_vm0, %v390_v60 }
  0xf6   : > { %v732_v13 = vpop.permute.xlu1 %731  ;;  %1433 = vmatpush3.bf16.xpose.msk.msra.mxu1 %vm1975_vm1, %v1428_v4  ;;  %1291 = vmatprep.mubr.msk.f32.mxu1 %vm225_vm0, %v392_v62 }
  0xf7   : > { %1436 = vmatprep.subr.msk.bf16.mxu1 %vm1975_vm1, %v1434_v11 }
  0xf8   : > { %v1548_v16 = vpop.permute.xlu0 %1547 }
  0xf9   : > { %1292 = vmatmul.mubr.msk.f32.gmra.mrb[6].mxu1 %vm225_vm0, %v394_v63  ;;  %v1550_v17 = vunpack.i.h.bf16 %v1548_v16  ;;  %v1549_v18 = vunpack.i.l.bf16 %v1548_v16 }
  0xfa   : > { %v1553_v19 = vpop.permute.xlu1 %1552  ;;  %1338 = vmatprep.mubr.msk.f32.mxu1 %vm225_vm0, %v718_v2 }
  0xfb   : > { %v1555_v20 = vunpack.i.h.bf16 %v1553_v19  ;;  %v1554_v21 = vunpack.i.l.bf16 %v1553_v19  ;;  %v1398_v23 = vpack.c.bf16 %v1550_v17, %v1549_v18 }
  0xfc   : > { %v1558_v25 = vpop.permute.xlu0 %1557 }
  0xfd   : > { %v1404_v24 = vpack.c.bf16 %v1555_v20, %v1554_v21  ;;  %1400 = vmatprep.subr.msk.bf16.mxu0 %vm1975_vm1, %v1398_v23  ;;  %v1560_v26 = vunpack.i.h.bf16 %v1558_v25  ;;  %v1559_v27 = vunpack.i.l.bf16 %v1558_v25 }
  0xfe   : > { %1439 = vmatpush3.bf16.xpose.msk.msra.mxu1 %vm1975_vm1, %v1434_v11  ;;  %1403 = vmatpush3.bf16.xpose.msk.msra.mxu0 %vm1975_vm1, %v1398_v23  ;;  %v1563_v31 = vpop.permute.xlu1 %1562 }
  0xff   : > { %1442 = vmatprep.subr.msk.bf16.mxu1 %vm1975_vm1, %v1440_v22  ;;  %1406 = vmatprep.subr.msk.bf16.mxu0 %vm1975_vm1, %v1404_v24  ;;  %v1410_v29 = vpack.c.bf16 %v1560_v26, %v1559_v27  ;;  %v1565_v32 = vunpack.i.h.bf16 %v1563_v31  ;;  %v1564_v33 = vunpack.i.l.bf16 %v1563_v31 }
 0x100   : > { %v549_v28 = vpop.permute.xlu0 %548 }
 0x101   : > { %1310 = vmatprep.mubr.msk.f32.mxu0 %vm225_vm0, %v549_v28  ;;  %v1416_v34 = vpack.c.bf16 %v1565_v32, %v1564_v33 }
 0x102   : > { %v551_v35 = vpop.permute.xlu1 %550 }
 0x104   : > { %v553_v36 = vpop.permute.xlu0 %552 }
 0x106   : > { %1445 = vmatpush3.bf16.xpose.msk.msra.mxu1 %vm1975_vm1, %v1440_v22  ;;  %1409 = vmatpush3.bf16.xpose.msk.msra.mxu0 %vm1975_vm1, %v1404_v24  ;;  %v555_v37 = vpop.permute.xlu1 %554 }
 0x107   : > { %1412 = vmatprep.subr.msk.bf16.mxu0 %vm1975_vm1, %v1410_v29 }
 0x108   : > { %v557_v38 = vpop.permute.xlu0 %556 }
 0x10a   : > { %v559_v39 = vpop.permute.xlu1 %558 }
 0x10c   : > { %v561_v40 = vpop.permute.xlu0 %560 }
 0x10d   : > { %1339 = vmatmul.mubr.msk.f32.vlgmr.msra.gmra.mrb[8].mxu1 %vm225_vm0, %v720_v3 }
 0x10e   : > { %1341 = vmatprep.mubr.msk.f32.mxu1 %vm225_vm0, %v722_v5  ;;  %1415 = vmatpush3.bf16.xpose.msk.msra.mxu0 %vm1975_vm1, %v1410_v29  ;;  %v563_v41 = vpop.permute.xlu1 %562 }
 0x10f   : > { %1418 = vmatprep.subr.msk.bf16.mxu0 %vm1975_vm1, %v1416_v34 }
 0x111   : > { %1342 = vmatmul.mubr.msk.f32.gmra.mrb[10].mxu1 %vm225_vm0, %v724_v6 }
 0x112   : > { %1344 = vmatprep.mubr.msk.f32.mxu1 %vm225_vm0, %v726_v9 }
 0x115   : > { %1345 = vmatmul.mubr.msk.f32.gmra.mrb[12].mxu1 %vm225_vm0, %v728_v10 }
 0x116   : > { %1347 = vmatprep.mubr.msk.f32.mxu1 %vm225_vm0, %v730_v12  ;;  %1421 = vmatpush3.bf16.xpose.msk.msra.mxu0 %vm1975_vm1, %v1416_v34 }
 0x119   : > { %1348 = vmatmul.mubr.msk.f32.gmra.mrb[14].mxu1 %vm225_vm0, %v732_v13 }
 0x11d   : > { %1311 = vmatmul.mubr.msk.f32.vlgmr.msra.gmra.mrb[8].mxu0 %vm225_vm0, %v551_v35 }
 0x11e   : > { %1313 = vmatprep.mubr.msk.f32.mxu0 %vm225_vm0, %v553_v36 }
 0x121   : > { %1314 = vmatmul.mubr.msk.f32.gmra.mrb[10].mxu0 %vm225_vm0, %v555_v37 }
 0x122   : > { %1316 = vmatprep.mubr.msk.f32.mxu0 %vm225_vm0, %v557_v38 }
 0x125   : > { %1317 = vmatmul.mubr.msk.f32.gmra.mrb[12].mxu0 %vm225_vm0, %v559_v39 }
 0x126   : > { %1319 = vmatprep.mubr.msk.f32.mxu0 %vm225_vm0, %v561_v40 }
 0x129   : > { %1320 = vmatmul.mubr.msk.f32.gmra.mrb[14].mxu0 %vm225_vm0, %v563_v41 }
 0x14b   : > { %v1256_v30 = vpop.f32.mrb[0].mxu0 }
 0x14c   : > { %v340_v42 = vpop.f32.mrb[1].mxu0 }
 0x14f   : > { %v1259_v43 = vpop.f32.mrb[2].mxu0 }
 0x150   : > { %v350_v44 = vpop.f32.mrb[3].mxu0 }
 0x153   : > { %v1262_v45 = vpop.f32.mrb[4].mxu0 }
 0x154   : > { %v2080_v46 = vpop.f32.mrb[5].mxu0 }
 0x157   : > { %v2082_v47 = vpop.f32.mrb[6].mxu0 }
 0x158   : > { %v2085_v50 = vpop.f32.mrb[7].mxu0 }
 0x1c0   : > { %v1284_v48 = vpop.f32.mrb[0].mxu1 }
 0x1c1   : > { %v509_v49 = vpop.f32.mrb[1].mxu1  ;;  %896 = vrot.lane.b32.xlu1 %v1284_v48, %s1705_s6 }
 0x1c2   : > { %894 = vrot.lane.b32.xlu0 %v509_v49, %s1705_s6 }
 0x1c4   : > { %v1287_v51 = vpop.f32.mrb[2].mxu1 }
 0x1c5   : > { %v519_v52 = vpop.f32.mrb[3].mxu1  ;;  %900 = vrot.lane.b32.xlu1 %v1287_v51, %s1705_s6 }
 0x1c6   : > { %898 = vrot.lane.b32.xlu0 %v519_v52, %s1705_s6 }
 0x1c8   : > { %v1290_v53 = vpop.f32.mrb[4].mxu1 }
 0x1c9   : > { %v529_v54 = vpop.f32.mrb[5].mxu1  ;;  %904 = vrot.lane.b32.xlu1 %v1290_v53, %s1705_s6 }
 0x1ca   : > { %902 = vrot.lane.b32.xlu0 %v529_v54, %s1705_s6 }
 0x1cc   : > { %v1293_v55 = vpop.f32.mrb[6].mxu1 }
 0x1cd   : > { %v539_v56 = vpop.f32.mrb[7].mxu1  ;;  %908 = vrot.lane.b32.xlu1 %v1293_v55, %s1705_s6 }
 0x1ce   : > { %906 = vrot.lane.b32.xlu0 %v539_v56, %s1705_s6 }
 0x1e0   : > { %v1340_v57 = vpop.f32.mrb[8].mxu1 }
 0x1e1   : > { %928 = vrot.lane.b32.xlu1 %v1340_v57, %s1705_s6  ;;  %v847_v58 = vpop.f32.mrb[9].mxu1 }
 0x1e2   : > { %926 = vrot.lane.b32.xlu0 %v847_v58, %s1705_s6 }
 0x1e4   : > { %v1343_v59 = vpop.f32.mrb[10].mxu1 }
 0x1e5   : > { %932 = vrot.lane.b32.xlu1 %v1343_v59, %s1705_s6  ;;  %v857_v60 = vpop.f32.mrb[11].mxu1 }
 0x1e6   : > { %930 = vrot.lane.b32.xlu0 %v857_v60, %s1705_s6 }
 0x1e8   : > { %v1346_v61 = vpop.f32.mrb[12].mxu1 }
 0x1e9   : > { %936 = vrot.lane.b32.xlu1 %v1346_v61, %s1705_s6  ;;  %v867_v62 = vpop.f32.mrb[13].mxu1 }
 0x1ea   : > { %934 = vrot.lane.b32.xlu0 %v867_v62, %s1705_s6 }
 0x1ec   : > { %v1349_v63 = vpop.f32.mrb[14].mxu1 }
 0x1ed   : > { %940 = vrot.lane.b32.xlu1 %v1349_v63, %s1705_s6  ;;  %v877_v0 = vpop.f32.mrb[15].mxu1 }
 0x1ee   : > { %938 = vrot.lane.b32.xlu0 %v877_v0, %s1705_s6 }
 0x1f0   : > { %v1312_v1 = vpop.f32.mrb[8].mxu0 }
 0x1f1   : > { %v678_v2 = vpop.f32.mrb[9].mxu0 }
 0x1f4   : > { %v1315_v3 = vpop.f32.mrb[10].mxu0 }
 0x1f5   : > { %v688_v4 = vpop.f32.mrb[11].mxu0 }
 0x1f8   : > { %v1318_v5 = vpop.f32.mrb[12].mxu0 }
 0x1f9   : > { %v698_v6 = vpop.f32.mrb[13].mxu0 }
 0x1fc   : > { %v1321_v7 = vpop.f32.mrb[14].mxu0 }
 0x1fd   : > { %v708_v8 = vpop.f32.mrb[15].mxu0 }
 0x233   : > { %v897_v9 = vpop.permute.xlu1 %896 }
 0x234   : > { %v895_v10 = vpop.permute.xlu0 %894  ;;  %v952_v11 = vsel %vm950_vm2, %v1256_v30, %v897_v9 }
 0x235   : > { %969 = vst [vmem:[%s2104_s16 + $0x10] sm:$0xff] %v952_v11  ;;  %v951_v12 = vsel %vm950_vm2, %v340_v42, %v895_v10 }
 0x236   : > { %967 = vst [vmem:[%s2104_s16] sm:$0xff] %v951_v12 }
 0x237   : > { %v901_v13 = vpop.permute.xlu1 %900 }
 0x238   : > { %v899_v14 = vpop.permute.xlu0 %898  ;;  %v954_v15 = vsel %vm950_vm2, %v1259_v43, %v901_v13 }
 0x239   : > { %973 = vst [vmem:[%s2104_s16 + $0x30] sm:$0xff] %v954_v15  ;;  %v953_v16 = vsel %vm950_vm2, %v350_v44, %v899_v14 }
 0x23a   : > { %971 = vst [vmem:[%s2104_s16 + $0x20] sm:$0xff] %v953_v16 }
 0x23b   : > { %v905_v17 = vpop.permute.xlu1 %904 }
 0x23c   : > { %v903_v18 = vpop.permute.xlu0 %902  ;;  %v956_v19 = vsel %vm950_vm2, %v1262_v45, %v905_v17 }
 0x23d   : > { %977 = vst [vmem:[%s2104_s16 + $0x50] sm:$0xff] %v956_v19  ;;  %v955_v20 = vsel %vm950_vm2, %v2080_v46, %v903_v18 }
 0x23e   : > { %975 = vst [vmem:[%s2104_s16 + $0x40] sm:$0xff] %v955_v20 }
 0x23f   : > { %v909_v21 = vpop.permute.xlu1 %908 }
 0x240   : > { %v907_v22 = vpop.permute.xlu0 %906  ;;  %v958_v23 = vsel %vm950_vm2, %v2082_v47, %v909_v21 }
 0x241   : > { %981 = vst [vmem:[%s2104_s16 + $0x70] sm:$0xff] %v958_v23  ;;  %v957_v24 = vsel %vm950_vm2, %v2085_v50, %v907_v22 }
 0x242   : > { %979 = vst [vmem:[%s2104_s16 + $0x60] sm:$0xff] %v957_v24 }
 0x253   : > { %v929_v25 = vpop.permute.xlu1 %928 }
 0x254   : > { %v960_v26 = vsel %vm950_vm2, %v1312_v1, %v929_v25  ;;  %v927_v27 = vpop.permute.xlu0 %926 }
 0x255   : > { %970 = vst [vmem:[%s2104_s16 + $0x18] sm:$0xff] %v960_v26  ;;  %v959_v28 = vsel %vm950_vm2, %v678_v2, %v927_v27 }
 0x256   : > { %968 = vst [vmem:[%s2104_s16 + $0x8] sm:$0xff] %v959_v28 }
 0x257   : > { %v933_v29 = vpop.permute.xlu1 %932 }
 0x258   : > { %v962_v31 = vsel %vm950_vm2, %v1315_v3, %v933_v29  ;;  %v931_v32 = vpop.permute.xlu0 %930 }
 0x259   : > { %974 = vst [vmem:[%s2104_s16 + $0x38] sm:$0xff] %v962_v31  ;;  %v961_v33 = vsel %vm950_vm2, %v688_v4, %v931_v32 }
 0x25a   : > { %972 = vst [vmem:[%s2104_s16 + $0x28] sm:$0xff] %v961_v33 }
 0x25b   : > { %v937_v34 = vpop.permute.xlu1 %936 }
 0x25c   : > { %v964_v35 = vsel %vm950_vm2, %v1318_v5, %v937_v34  ;;  %v935_v36 = vpop.permute.xlu0 %934 }
 0x25d   : > { %978 = vst [vmem:[%s2104_s16 + $0x58] sm:$0xff] %v964_v35  ;;  %v963_v37 = vsel %vm950_vm2, %v698_v6, %v935_v36 }
 0x25e   : > { %976 = vst [vmem:[%s2104_s16 + $0x48] sm:$0xff] %v963_v37 }
 0x25f   : > { %v941_v38 = vpop.permute.xlu1 %940 }
 0x260   : > { %v966_v39 = vsel %vm950_vm2, %v1321_v7, %v941_v38  ;;  %v939_v40 = vpop.permute.xlu0 %938 }
 0x261   : > { %982 = vst [vmem:[%s2104_s16 + $0x78] sm:$0xff] %v966_v39  ;;  %v965_v41 = vsel %vm950_vm2, %v708_v8, %v939_v40 }
 0x262   : > { %980 = vst [vmem:[%s2104_s16 + $0x68] sm:$0xff] %v965_v41 }
 0x263   : > { %1639 = shalt.err (!%p1636_p11)
}
 0x264   : > { %s1640_s26 = scalar_lea.hbm %s2141_s25, 2048  ;;  %s1644_s29 = scalar_lea.hbm %s2193_s2, 4096 }
 0x265   : > { %p1641_p0 = scmp.ne.s32.totalorder %s2141_s25, %s1640_s26  ;;  %p1645_p3 = scmp.lt.u32.totalorder %s2141_s25, %s2193_s2 }
 0x266   : > { %p1646_p5 = scmp.lt.u32.totalorder %s1644_s29, %s1640_s26  ;;  %p1648_p13 = scmp.lt.u32.totalorder %s1640_s26, %s2141_s25 }
 0x267   : > { %p1642_p4 = pnand %p1641_p0, %p2206_p2 }
 0x268   : > { %p1647_p6 = por %p1646_p5, %p1645_p3 }
 0x269   : > { %p1643_p1 = pneg %p1642_p4 }
 0x26a   : > { %p1649_p12 = por %p1648_p13, %p1647_p6 }
 0x26c   : > { %p1650_p10 = pnand %p1649_p12, %p1643_p1 }
 0x26e   : > { %1653 = shalt.err (!%p1650_p10)
}
 0x26f   : > { %s1707_s6 = smov 256   ;;  %s1708_s14 = smov 512  }
 0x270   : > { %s1709_s16 = smov 16  }
 0x271   : > { %1450 = dma.vmem_to_hbm [thread:$0]  (%p2206_p2), %s2143_s28, 2048, %s2141_s25, %s984_s13, %s1707_s6, %s1708_s14, %s1709_s16  }
 0x272 PF: > { %s1012_s19 = sand.u32 1, %s1684_s9   ;;  %p2207_p7 = scmp.ne.s32.totalorder %s2199_s22, 0 }
 0x273   : > { %p2208_p8 = scmp.ge.s32.totalorder %s1696_s12, 2  ;;  %s1013_s27 = scalar_lea.sflag [#allocation4], %s1012_s19 }
 0x275   : > { %p1460_p9 = pnand %p2208_p8, %p2207_p7 }
 0x277   : > { %1679 = dma.done.wait (!%p1460_p9), %s1013_s27, 2048  }
 0x278   : > { %1681 = vsyncadd (!%p1460_p9), %s1013_s27, 4294965248  ;;  %p18_p11 = scmp.ge.s32.totalorder %s1750_s15, 4   ;;  %s2209_s9 = smov %s1688_s10 }
 0x279   : > { %s2210_s10 = smov %s1692_s11  ;;  %s2211_s11 = smov %s1762_s18 }
 0x27a   : > { %s2212_s12 = smov %s1750_s15  ;;  %20 = sbr.rel (!%p18_p11) target bundleno = 7 (0x7), region = 86 }
 0x281   :  { %1018 = vsyncpa [#allocation3], 1 }
 0x282   :  { %1020 = vsyncpa [#allocation3 + $0x1], 1 }
 0x283   :  { %1021 = vsyncpa [#allocation6], 1 }
 0x284   :  { %1023 = vsyncpa [#allocation6 + $0x1], 1 }
 0x285   :  { %1024 = vsyncpa [#allocation4], 1 }
 0x286   :  { %1026 = vsyncpa [#allocation4 + $0x1], 1 }

</bundles_post_ra>
